<compile_context>
chip_gen: v5e
topology: v5e:2x2
jax: 0.10.0
libtpu: 0.0.40
codegen_flags: <defaults>
</compile_context>

<pallas_src>
import functools

import jax
import jax.numpy as jnp
from jax import lax
from jax.experimental import pallas as pl
from jax.experimental.pallas import tpu as pltpu


def _cnn_text_kernel(ids_ref, table_ref, wf_ref, bf_ref, mask_ref,
                     fcw_ref, fcb_ref, out_ref, *,
                     vocab, l_pad, t_max, k_max):
    """One sequence per grid step: gather + fused conv + pool + FC in VMEM.

    ids_ref : (1, l_pad, 1) int32   token ids, padded with -1 sentinel rows
    table   : (V, D)                embedding table (compute dtype)
    wf      : (k_max*D, n_ks*C)     packed conv weights (zero-padded taps)
    bf      : (1, n_ks*C) f32       packed conv biases
    mask    : (t_max, n_ks*C) f32   1.0 where the time position is valid
    fcw     : (n_ks*C, class_num)   fc weight (pre-transposed)
    fcb     : (1, class_num) f32
    out     : (1, 1, class_num) f32
    """
    # 1) Embedding gather as a one-hot MXU matmul (padded ids=-1 -> zero rows).
    ids = ids_ref[0]                                              # (l_pad, 1)
    onehot = (ids == lax.broadcasted_iota(jnp.int32, (l_pad, vocab), 1))
    onehot = onehot.astype(table_ref.dtype)
    emb = jnp.dot(onehot, table_ref[...],
                  preferred_element_type=jnp.float32)             # (l_pad, D)
    emb = emb.astype(wf_ref.dtype)

    # 2) im2col ONCE: patches[t] = [emb[t], ..., emb[t+k_max-1]] -> (t_max, k_max*D)
    patches = jnp.concatenate([emb[k:k + t_max, :] for k in range(k_max)],
                              axis=1)

    # 3) All kernel sizes in a single matmul, then bias + ReLU + validity mask.
    conv = jnp.dot(patches, wf_ref[...], preferred_element_type=jnp.float32)
    conv = jnp.maximum(conv + bf_ref[...], 0.0) * mask_ref[...]   # (t_max, nks*C)

    # 4) max_pool1d over time; channels are already in fc order (no concat).
    pooled = jnp.max(conv, axis=0, keepdims=True)                 # (1, nks*C)

    # 5) Final Linear.  TODO(synk): nn.Dropout(0.5) is identity (eval mode).
    logit = jnp.dot(pooled.astype(fcw_ref.dtype), fcw_ref[...],
                    preferred_element_type=jnp.float32) + fcb_ref[...]
    out_ref[0] = logit.astype(out_ref.dtype)


def cnn_text_forward(token_ids, embed_table, conv_params, fc_w, fc_b,
                     kernel_sizes, kernel_num, class_num,
                     compute_dtype=jnp.float32):
    """Static weight packing in plain JAX, everything else in one pallas_call."""
    B, L = token_ids.shape
    V, D = embed_table.shape
    ks = tuple(kernel_sizes)
    C = kernel_num
    k_max, k_min = max(ks), min(ks)
    t_max = L - k_min + 1                       # longest valid conv output
    l_pad = L + (k_max - k_min)                 # emb rows needed by im2col
    nkc = len(ks) * C

    # ---- one-time static packing (layout plumbing, not compute) ----
    ids_pad = jnp.pad(token_ids.astype(jnp.int32), ((0, 0), (0, l_pad - L)),
                      constant_values=-1)[..., None]              # (B, l_pad, 1)

    w_cols, b_cols, limits = [], [], []
    for (w, b), K in zip(conv_params, ks):
        w = jnp.pad(w, ((0, k_max - K), (0, 0), (0, 0)))          # (k_max, D, C)
        w_cols.append(w.reshape(k_max * D, C))
        b_cols.append(b.reshape(1, C))
        limits.append(jnp.full((C,), L - K + 1, jnp.int32))
    w_fused = jnp.concatenate(w_cols, axis=1).astype(compute_dtype)  # (k_max*D, nkc)
    b_fused = jnp.concatenate(b_cols, axis=1).astype(jnp.float32)    # (1, nkc)
    limits = jnp.concatenate(limits)                                  # (nkc,)
    mask = (jnp.arange(t_max, dtype=jnp.int32)[:, None] < limits[None, :]
            ).astype(jnp.float32)                                     # (t_max, nkc)

    table = embed_table.astype(compute_dtype)
    fcw = fc_w.astype(compute_dtype)
    fcb = fc_b.astype(jnp.float32)

    kernel = functools.partial(_cnn_text_kernel, vocab=V, l_pad=l_pad,
                               t_max=t_max, k_max=k_max)

    def full(shape):  # whole-array block, same block for every grid step
        return pl.BlockSpec(shape, lambda b: (0,) * len(shape))

    out = pl.pallas_call(
        kernel,
        out_shape=jax.ShapeDtypeStruct((B, 1, class_num), jnp.float32),
        grid=(B,),
        in_specs=[
            pl.BlockSpec((1, l_pad, 1), lambda b: (b, 0, 0)),   # token ids
            full((V, D)),                                       # embed table
            full((k_max * D, nkc)),                             # packed conv W
            full((1, nkc)),                                     # packed conv b
            full((t_max, nkc)),                                 # validity mask
            full((nkc, class_num)),                             # fc weight
            full((1, class_num)),                               # fc bias
        ],
        out_specs=pl.BlockSpec((1, 1, class_num), lambda b: (b, 0, 0)),
        compiler_params=pltpu.CompilerParams(
            dimension_semantics=("parallel",)),
    )(ids_pad, table, w_fused, b_fused, mask, fcw, fcb)
    return out.reshape(B, class_num)


if __name__ == "__main__":
    # Module hyper-parameters (small, consistent with CNN_Text.__init__)
    embed_num = 64        # vocab size V
    embed_dim = 32        # D
    class_num = 8
    Ci = 1                # single input channel (implicit in the (L, D) layout)
    kernel_num = 16       # C (output channels per conv)
    kernel_sizes = (3, 4, 5)
    seq_len = 16          # L
    batch = 8             # B (batched sequences, one per grid step)

    # Deterministic parameter init
    key = jax.random.PRNGKey(0)
    keys = jax.random.split(key, 3 + 2 * len(kernel_sizes))
    embed_table = 0.1 * jax.random.normal(keys[0], (embed_num, embed_dim), jnp.float32)
    conv_params = []
    for i, K in enumerate(kernel_sizes):
        # PyTorch conv weight (C, 1, K, D) stored pre-transposed as (K, D, C)
        w = 0.1 * jax.random.normal(keys[1 + 2 * i], (K, embed_dim, kernel_num), jnp.float32)
        b = 0.1 * jax.random.normal(keys[2 + 2 * i], (1, kernel_num), jnp.float32)
        conv_params.append((w, b))
    fc_w = 0.1 * jax.random.normal(
        keys[-2], (len(kernel_sizes) * kernel_num, class_num), jnp.float32)
    fc_b = 0.1 * jax.random.normal(keys[-1], (1, class_num), jnp.float32)

    # Deterministic example input: a batch of token-id sequences
    token_ids = jax.random.randint(jax.random.PRNGKey(1), (batch, seq_len), 0, embed_num)

    # On v6e/v7x, pass compute_dtype=jnp.bfloat16 for bf16 MXU operands
    # (f32 accumulation is kept).  f32 here to keep the tight reference check.
    out = cnn_text_forward(token_ids, embed_table, conv_params, fc_w, fc_b,
                           kernel_sizes, kernel_num, class_num,
                           compute_dtype=jnp.float32)
    out = jax.block_until_ready(out)
    assert out.shape == (batch, class_num)

    # Pure-JAX reference of the same math (PyTorch eval-mode semantics)
    emb = jnp.take(embed_table, token_ids, axis=0)            # (B, L, D)
    feats = []
    for (w, b), K in zip(conv_params, kernel_sizes):
        T = seq_len - K + 1
        s = sum(jnp.einsum("btd,dc->btc", emb[:, k:k + T, :], w[k])
                for k in range(K)) + b                        # (B, T, C)
        feats.append(jnp.max(jnp.maximum(s, 0.0), axis=1))    # (B, C)
    ref = jnp.concatenate(feats, axis=1) @ fc_w + fc_b        # (B, class_num)
    assert jnp.allclose(out, ref, atol=1e-4, rtol=1e-4), (out, ref)

    print("KERNEL_OK")
</pallas_src>

<mosaic_0001>
module attributes {stable_mosaic.version = 11 : i64} {
  func.func @_cnn_text_kernel(%arg0: i32, %arg1: memref<1x18x1xi32, #tpu.memory_space<vmem>>, %arg2: memref<64x32xf32, #tpu.memory_space<vmem>>, %arg3: memref<160x48xf32, #tpu.memory_space<vmem>>, %arg4: memref<1x48xf32, #tpu.memory_space<vmem>>, %arg5: memref<14x48xf32, #tpu.memory_space<vmem>>, %arg6: memref<48x8xf32, #tpu.memory_space<vmem>>, %arg7: memref<1x8xf32, #tpu.memory_space<vmem>>, %arg8: memref<1x1x8xf32, #tpu.memory_space<vmem>>) attributes {dimension_semantics = [#tpu.dimension_semantics<parallel>], iteration_bounds = array<i64: 8>, scalar_prefetch = 0 : i64, scratch_operands = 0 : i64, tpu.core_type = #tpu.core_type<tc>, window_params = [{transform_indices = @transform_0, window_bounds = array<i64: 1, 18, 1>}, {pipeline_mode = #tpu.pipeline_mode<synchronous>, transform_indices = @transform_1, window_bounds = array<i64: 64, 32>}, {pipeline_mode = #tpu.pipeline_mode<synchronous>, transform_indices = @transform_2, window_bounds = array<i64: 160, 48>}, {pipeline_mode = #tpu.pipeline_mode<synchronous>, transform_indices = @transform_3, window_bounds = array<i64: 1, 48>}, {pipeline_mode = #tpu.pipeline_mode<synchronous>, transform_indices = @transform_4, window_bounds = array<i64: 14, 48>}, {pipeline_mode = #tpu.pipeline_mode<synchronous>, transform_indices = @transform_5, window_bounds = array<i64: 48, 8>}, {pipeline_mode = #tpu.pipeline_mode<synchronous>, transform_indices = @transform_6, window_bounds = array<i64: 1, 8>}, {transform_indices = @transform_7, window_bounds = array<i64: 1, 1, 8>}]} {
    %c0 = arith.constant 0 : index
    %c0_0 = arith.constant 0 : index
    %c0_1 = arith.constant 0 : index
    %0 = vector.load %arg1[%c0, %c0_0, %c0_1] : memref<1x18x1xi32, #tpu.memory_space<vmem>>, vector<1x18x1xi32>
    %1 = vector.shape_cast %0 : vector<1x18x1xi32> to vector<18x1xi32>
    %2 = tpu.iota {dimensions = array<i32: 1>} : vector<18x64xi32>
    %3 = vector.broadcast %1 : vector<18x1xi32> to vector<18x64xi32>
    %4 = arith.cmpi eq, %3, %2 : vector<18x64xi32>
    %5 = arith.extui %4 : vector<18x64xi1> to vector<18x64xi32>
    %6 = arith.sitofp %5 : vector<18x64xi32> to vector<18x64xf32>
    %c0_2 = arith.constant 0 : index
    %c0_3 = arith.constant 0 : index
    %7 = vector.load %arg2[%c0_2, %c0_3] : memref<64x32xf32, #tpu.memory_space<vmem>>, vector<64x32xf32>
    %cst = arith.constant dense<0.000000e+00> : vector<18x32xf32>
    %8 = tpu.matmul %6, %7, %cst {dimension_numbers = #tpu.dot_dimension_numbers<[1], [0], [0], [1], [0, 0, 1, 1], [], []>} : vector<18x64xf32>, vector<64x32xf32>, vector<18x32xf32> -> vector<18x32xf32>
    %9 = vector.extract_strided_slice %8 {offsets = [0, 0], sizes = [14, 32], strides = [1, 1]} : vector<18x32xf32> to vector<14x32xf32>
    %10 = vector.extract_strided_slice %8 {offsets = [1, 0], sizes = [14, 32], strides = [1, 1]} : vector<18x32xf32> to vector<14x32xf32>
    %11 = vector.extract_strided_slice %8 {offsets = [2, 0], sizes = [14, 32], strides = [1, 1]} : vector<18x32xf32> to vector<14x32xf32>
    %12 = vector.extract_strided_slice %8 {offsets = [3, 0], sizes = [14, 32], strides = [1, 1]} : vector<18x32xf32> to vector<14x32xf32>
    %13 = vector.extract_strided_slice %8 {offsets = [4, 0], sizes = [14, 32], strides = [1, 1]} : vector<18x32xf32> to vector<14x32xf32>
    %14 = tpu.concatenate %9, %10, %11, %12, %13 in 1 : vector<14x32xf32>, vector<14x32xf32>, vector<14x32xf32>, vector<14x32xf32>, vector<14x32xf32> -> vector<14x160xf32>
    %c0_4 = arith.constant 0 : index
    %c0_5 = arith.constant 0 : index
    %15 = vector.load %arg3[%c0_4, %c0_5] : memref<160x48xf32, #tpu.memory_space<vmem>>, vector<160x48xf32>
    %cst_6 = arith.constant dense<0.000000e+00> : vector<14x48xf32>
    %16 = tpu.matmul %14, %15, %cst_6 {dimension_numbers = #tpu.dot_dimension_numbers<[1], [0], [0], [1], [0, 0, 1, 1], [], []>} : vector<14x160xf32>, vector<160x48xf32>, vector<14x48xf32> -> vector<14x48xf32>
    %c0_7 = arith.constant 0 : index
    %c0_8 = arith.constant 0 : index
    %17 = vector.load %arg4[%c0_7, %c0_8] : memref<1x48xf32, #tpu.memory_space<vmem>>, vector<1x48xf32>
    %18 = vector.broadcast %17 : vector<1x48xf32> to vector<14x48xf32>
    %19 = arith.addf %16, %18 : vector<14x48xf32>
    %cst_9 = arith.constant 0.000000e+00 : f32
    %20 = vector.broadcast %cst_9 : f32 to vector<14x48xf32>
    %21 = arith.maximumf %19, %20 : vector<14x48xf32>
    %c0_10 = arith.constant 0 : index
    %c0_11 = arith.constant 0 : index
    %22 = vector.load %arg5[%c0_10, %c0_11] : memref<14x48xf32, #tpu.memory_space<vmem>>, vector<14x48xf32>
    %23 = arith.mulf %21, %22 : vector<14x48xf32>
    %cst_12 = arith.constant dense<0xFF800000> : vector<48xf32>
    %24 = vector.multi_reduction <maximumf>, %23, %cst_12 [0] : vector<14x48xf32> to vector<48xf32>
    %25 = vector.shape_cast %24 : vector<48xf32> to vector<1x48xf32>
    %c0_13 = arith.constant 0 : index
    %c0_14 = arith.constant 0 : index
    %26 = vector.load %arg6[%c0_13, %c0_14] : memref<48x8xf32, #tpu.memory_space<vmem>>, vector<48x8xf32>
    %cst_15 = arith.constant dense<0.000000e+00> : vector<1x8xf32>
    %27 = tpu.matmul %25, %26, %cst_15 {dimension_numbers = #tpu.dot_dimension_numbers<[1], [0], [0], [1], [0, 0, 1, 1], [], []>} : vector<1x48xf32>, vector<48x8xf32>, vector<1x8xf32> -> vector<1x8xf32>
    %c0_16 = arith.constant 0 : index
    %c0_17 = arith.constant 0 : index
    %28 = vector.load %arg7[%c0_16, %c0_17] : memref<1x8xf32, #tpu.memory_space<vmem>>, vector<1x8xf32>
    %29 = arith.addf %27, %28 : vector<1x8xf32>
    %c0_18 = arith.constant 0 : index
    %c0_19 = arith.constant 0 : index
    %c0_20 = arith.constant 0 : index
    %30 = vector.load %arg8[%c0_18, %c0_19, %c0_20] : memref<1x1x8xf32, #tpu.memory_space<vmem>>, vector<1x1x8xf32>
    %31 = vector.shape_cast %30 : vector<1x1x8xf32> to vector<1x8xf32>
    %32 = vector.shape_cast %29 : vector<1x8xf32> to vector<1x1x8xf32>
    tpu.vector_store %arg8[%c0_18, %c0_19, %c0_20], %32 {strides = array<i32>} : memref<1x1x8xf32, #tpu.memory_space<vmem>>, vector<1x1x8xf32>,
    return
  }
  func.func @transform_0(%arg0: i32) -> (i32, i32, i32) {
    %c0_i32 = arith.constant 0 : i32
    %c0_i32_0 = arith.constant 0 : i32
    %c0_i32_1 = arith.constant 0 : i32
    return %arg0, %c0_i32, %c0_i32_0 : i32, i32, i32
  }
  func.func @transform_1(%arg0: i32) -> (i32, i32) {
    %c0_i32 = arith.constant 0 : i32
    %c0_i32_0 = arith.constant 0 : i32
    %c0_i32_1 = arith.constant 0 : i32
    return %c0_i32, %c0_i32_0 : i32, i32
  }
  func.func @transform_2(%arg0: i32) -> (i32, i32) {
    %c0_i32 = arith.constant 0 : i32
    %c0_i32_0 = arith.constant 0 : i32
    %c0_i32_1 = arith.constant 0 : i32
    return %c0_i32, %c0_i32_0 : i32, i32
  }
  func.func @transform_3(%arg0: i32) -> (i32, i32) {
    %c0_i32 = arith.constant 0 : i32
    %c0_i32_0 = arith.constant 0 : i32
    %c0_i32_1 = arith.constant 0 : i32
    return %c0_i32, %c0_i32_0 : i32, i32
  }
  func.func @transform_4(%arg0: i32) -> (i32, i32) {
    %c0_i32 = arith.constant 0 : i32
    %c0_i32_0 = arith.constant 0 : i32
    %c0_i32_1 = arith.constant 0 : i32
    return %c0_i32, %c0_i32_0 : i32, i32
  }
  func.func @transform_5(%arg0: i32) -> (i32, i32) {
    %c0_i32 = arith.constant 0 : i32
    %c0_i32_0 = arith.constant 0 : i32
    %c0_i32_1 = arith.constant 0 : i32
    return %c0_i32, %c0_i32_0 : i32, i32
  }
  func.func @transform_6(%arg0: i32) -> (i32, i32) {
    %c0_i32 = arith.constant 0 : i32
    %c0_i32_0 = arith.constant 0 : i32
    %c0_i32_1 = arith.constant 0 : i32
    return %c0_i32, %c0_i32_0 : i32, i32
  }
  func.func @transform_7(%arg0: i32) -> (i32, i32, i32) {
    %c0_i32 = arith.constant 0 : i32
    %c0_i32_0 = arith.constant 0 : i32
    %c0_i32_1 = arith.constant 0 : i32
    return %arg0, %c0_i32, %c0_i32_0 : i32, i32, i32
  }
}

</mosaic_0001>

<bundles_post_ra>
// kernel: tpu_custom_call.1
= control target key start
LH: loop header
LB: loop body
LE: loop exit
PB: predicated region body
PF: predicated region fallthrough
CT: control target
= control target key end

     0   :  { %12 = vsyncpa [#allocation3], 0  ;;  %s980_s0 = inlined_call_operand.vmem [shape: s32[8,18,1], index: 0, kind: input, shape index: {}]   ;;  %s981_s1 = inlined_call_operand.vmem [shape: f32[64,32], index: 1, kind: input, shape index: {}]   ;;  %s982_s2 = inlined_call_operand.vmem [shape: f32[160,48], index: 2, kind: input, shape index: {}]   ;;  %s983_s3 = inlined_call_operand.vmem [shape: f32[1,48], index: 3, kind: input, shape index: {}]   ;;  %s984_s4 = inlined_call_operand.vmem [shape: f32[14,48], index: 4, kind: input, shape index: {}]   ;;  %s985_s5 = inlined_call_operand.vmem [shape: f32[48,8], index: 5, kind: input, shape index: {}]   ;;  %s986_s6 = inlined_call_operand.vmem [shape: f32[1,8], index: 6, kind: input, shape index: {}]   ;;  %s987_s7 = inlined_call_operand.hbm [shape: f32[8,1,8], index: 7, kind: output, shape index: {}]  }
   0x1   :  { %14 = vsyncpa [#allocation3 + $0x1], 0  ;;  %s756_s24 = smov 0   ;;  %s758_s25 = smov 0  }
   0x2   :  { %s760_s26 = smov 0   ;;  %s762_s27 = smov 0  }
   0x3 LB: > { %s777_s28 = sadd.s32 4294967295, %s709_s27   ;;  %s583_s29 = sadd.s32 4294967294, %s709_s27   ;;  %s709_s27 = sphi %s762_s27, %s993_s27   ;;  %s705_s26 = sphi %s760_s26, %s992_s26   ;;  %s701_s25 = sphi %s758_s25, %s991_s25   ;;  %s697_s24 = sphi %s756_s24, %s990_s24  }
   0x4   : > { %s781_s30 = sadd.s32 1, %s709_s27   ;;  %s179_s8 = sadd.s32 1, %s705_s26 }
   0x5   : > { %s176_s9 = ssub.s32 %s709_s27, %s781_s30  ;;  %p189_p0 = scmp.ne.s32.totalorder %s705_s26, %s701_s25 }
   0x6   : > { %p177_p1 = scmp.eq.s32.totalorder %s176_s9, 0  ;;  %p190_p2 = scmp.eq.s32.totalorder %s777_s28, 7 }
   0x7   : > { %p195_p3 = scmp.ne.s32.totalorder %s701_s25, %s697_s24  ;;  %p196_p4 = scmp.eq.s32.totalorder %s583_s29, 7 }
   0x8   : > { %s792_s10 = scalar_select %p177_p1, %s705_s26, %s179_s8  }
   0x9   : > { %p794_p5 = por %p190_p2, %p189_p0  ;;  %p798_p6 = por %p196_p4, %p195_p3 }
   0xa   : > { %p586_p7 = scmp.ge.s32.totalorder %s709_s27, 1  ;;  %p240_p8 = scmp.lt.s32.totalorder %s709_s27, 9 }
   0xc   : > { %p241_p9 = pnand %p586_p7, %p240_p8 }
   0xd   : > { %p271_p10 = scmp.lt.s32.totalorder (!%p241_p9), %s777_s28, 7  ;;  %s713_s18 = smov (!%p241_p9), 32  }
   0xe   : > { %244 = sbr.rel (%p241_p9) target bundleno = 692 (0x2b4), region = 48  ;;  %s714_s19 = smov (!%p241_p9), 64  }
   0xf   : > { %s269_s8 = sand.u32 (!%p241_p9), 1, %s701_s25   ;;  %s524_s14 = scalar_lea.hbm (!%p241_p9), %s987_s7, %s777_s28 }
  0x10   : > { %s667_s29 = scalar_lea.hbm (!%p241_p9), %s987_s7, 8 }
  0x13   : > { %v306_v0 = vld [vmem:[%s981_s1 + $0x38] sm:$0xff]  ;;  %v711_v1 = vmov 0   ;;  %v305_v2 = vld [vmem:[%s981_s1 + $0x30] sm:$0xff]  ;;  %s272_s17 = scalar_select %p271_p10, %s777_s28, 7  ;;  %v304_v3 = vld [vmem:[%s981_s1 + $0x28] sm:$0xff]  ;;  %v279_v12 = vlaneseq  ;;  %vm307_vm0 = vcmask 523264  }
  0x14   : > { %644 = vset.pattern.permute.xlu0 %v711_v1  ;;  %645 = vset.pattern.permute.xlu1 %v711_v1  ;;  %v303_v4 = vld [vmem:[%s981_s1 + $0x20] sm:$0xff]  ;;  %v302_v7 = vld [vmem:[%s981_s1 + $0x18] sm:$0xff]  ;;  %v301_v8 = vld [vmem:[%s981_s1 + $0x10] sm:$0xff]  ;;  %v712_v15 = vmov 0.0   ;;  %vm378_vm4 = vcmask 1043456   ;;  %vm355_vm5 = vcmask 1045504  }
  0x15   : > { %325 = vmatpush.msra.mxu0 %v306_v0  ;;  %s599_s20 = smul.u32 24, %s272_s17  ;;  %v300_v9 = vld [vmem:[%s981_s1 + $0x8] sm:$0xff]  ;;  %v299_v11 = vld [vmem:[%s981_s1] sm:$0xff]  ;;  %v280_v13 = vand.u32 127, %v279_v12  ;;  %v411_v21 = vld [vmem:[%s982_s2 + $0x98] sm:$0xff]  ;;  %vm384_vm6 = vcmask 261120  }
  0x16   : > { %v410_v22 = vld [vmem:[%s982_s2 + $0x90] sm:$0xff]  ;;  %455 = vmatpush.msra.mxu2 %v411_v21  ;;  %v409_v23 = vld [vmem:[%s982_s2 + $0x88] sm:$0xff]  ;;  %v408_v24 = vld [vmem:[%s982_s2 + $0x80] sm:$0xff]  ;;  %vm345_vm7 = vcmask 1046528   ;;  %vm366_vm8 = vcmask 1044480   ;;  %vm389_vm9 = vcmask 785408  }
  0x17   : > { %326 = vmatpush.msra.mxu0 %v305_v2  ;;  %s275_s23 = scalar_lea.vmem %s980_s0, %s599_s20  ;;  %v407_v25 = vld [vmem:[%s982_s2 + $0x78] sm:$0xff]  ;;  %v406_v26 = vld [vmem:[%s982_s2 + $0x70] sm:$0xff]  ;;  %s715_s20 = smov 96   ;;  %v405_v46 = vld [vmem:[%s982_s2 + $0x68] sm:$0xff]  ;;  %vm472_vm10 = vcmask 392192   ;;  %vm474_vm11 = vcmask 390144  }
  0x18   : > { %v276_v5 = vld [vmem:[%s275_s23] sm:$0xff]  ;;  %v278_v6 = vld [vmem:[%s275_s23 + $0x10] sm:$0x3]  ;;  %v277_v10 = vld [vmem:[%s275_s23 + $0x8] sm:$0xff]  ;;  %456 = vmatpush.msra.mxu2 %v410_v22  ;;  %420 = vmatpush.msra.mxu1 %v407_v25  ;;  %s270_s17 = scalar_lea.vmem [#allocation2], %s269_s8  ;;  %vm513_vm12 = vcmask 57344  }
  0x19   : > { %327 = vmatpush.msra.mxu0 %v304_v3  ;;  %282 = vperm.xlu0 %644, %v276_v5   ;;  %v404_v47 = vld [vmem:[%s982_s2 + $0x60] sm:$0xff]  ;;  %v403_v48 = vld [vmem:[%s982_s2 + $0x58] sm:$0xff]  ;;  %v402_v49 = vld [vmem:[%s982_s2 + $0x50] sm:$0xff] }
  0x1a   : > { %288 = vperm.xlu1 %645, %v278_v6   ;;  %457 = vmatpush.msra.mxu2 %v409_v23  ;;  %v401_v50 = vld [vmem:[%s982_s2 + $0x48] sm:$0xff]  ;;  %v400_v51 = vld [vmem:[%s982_s2 + $0x40] sm:$0xff]  ;;  %v399_v52 = vld [vmem:[%s982_s2 + $0x38] sm:$0xff] }
  0x1b   : > { %328 = vmatpush.msra.mxu0 %v303_v4  ;;  %421 = vmatpush.msra.mxu1 %v406_v26  ;;  %v398_v53 = vld [vmem:[%s982_s2 + $0x30] sm:$0xff]  ;;  %v397_v54 = vld [vmem:[%s982_s2 + $0x28] sm:$0xff]  ;;  %v396_v55 = vld [vmem:[%s982_s2 + $0x20] sm:$0xff] }
  0x1c   : > { %458 = vmatpush.msra.mxu2 %v408_v24  ;;  %v395_v56 = vld [vmem:[%s982_s2 + $0x18] sm:$0xff]  ;;  %v394_v57 = vld [vmem:[%s982_s2 + $0x10] sm:$0xff]  ;;  %v393_v58 = vld [vmem:[%s982_s2 + $0x8] sm:$0xff] }
  0x1d   : > { %329 = vmatpush.msra.mxu0 %v302_v7  ;;  %422 = vmatpush.msra.mxu1 %v405_v46  ;;  %v392_v59 = vld [vmem:[%s982_s2] sm:$0xff]  ;;  %v484_v12 = vld [vmem:[%s985_s5 + $0x8] sm:$0xff] }
  0x1e   : > { %v468_v23 = vld [vmem:[%s984_s4] sm:$0xff]  ;;  %v469_v25 = vld [vmem:[%s984_s4 + $0x8] sm:$0x3f] }
  0x1f   : > { %330 = vmatpush.msra.mxu0 %v301_v8  ;;  %423 = vmatpush.msra.mxu1 %v404_v47  ;;  %v488_v8 = vld [vmem:[%s985_s5 + $0x28] sm:$0xff] }
  0x20   : > { %503 = vmatpush.msra.mxu3 %v488_v8 }
  0x21   : > { %331 = vmatpush.msra.mxu0 %v300_v9  ;;  %285 = vperm.xlu0 %644, %v277_v10   ;;  %v487_v9 = vld [vmem:[%s985_s5 + $0x20] sm:$0xff]  ;;  %v486_v10 = vld [vmem:[%s985_s5 + $0x18] sm:$0xff] }
  0x22   : > { %424 = vmatpush.msra.mxu1 %v403_v48  ;;  %504 = vmatpush.msra.mxu3 %v487_v9 }
  0x23   : > { %332 = vmatpush.msra.mxu0 %v299_v11  ;;  %v485_v11 = vld [vmem:[%s985_s5 + $0x10] sm:$0xff] }
  0x24   : > { %425 = vmatpush.msra.mxu1 %v402_v49  ;;  %505 = vmatpush.msra.mxu3 %v486_v10 }
  0x26   : > { %426 = vmatpush.msra.mxu1 %v401_v50  ;;  %506 = vmatpush.msra.mxu3 %v485_v11 }
  0x28   : > { %427 = vmatpush.msra.mxu1 %v400_v51  ;;  %507 = vmatpush.msra.mxu3 %v484_v12 }
  0x2a   : > { %428 = vmatpush.msra.mxu1 %v399_v52 }
  0x2c   : > { %429 = vmatpush.msra.mxu1 %v398_v53 }
  0x2e   : > { %430 = vmatpush.msra.mxu1 %v397_v54 }
  0x30   : > { %431 = vmatpush.msra.mxu1 %v396_v55 }
  0x32   : > { %432 = vmatpush.msra.mxu1 %v395_v56 }
  0x34   : > { %433 = vmatpush.msra.mxu1 %v394_v57 }
  0x36   : > { %434 = vmatpush.msra.mxu1 %v393_v58 }
  0x38   : > { %435 = vmatpush.msra.mxu1 %v392_v59 }
  0x8b   : > { %v283_v14 = vpop.permute.xlu0 %282 }
  0x8c   : > { %vm290_vm1 = vcmp.eq.s32.totalorder %v283_v14, %v280_v13  ;;  %v289_v19 = vpop.permute.xlu1 %288  ;;  %v646_v14 = vld [vmem:[%s983_s3] ss:$0 sm:$0xff] }
  0x8d   : > { %v588_v16 = vsel %vm290_vm1, 1.0, %v712_v15  ;;  %vm292_vm3 = vcmp.eq.s32.totalorder %v289_v19, %v280_v13 }
  0x8e   : > { %591 = vmatmul.msk.f32.vlgmr.msra.gmra.mxu0 %vm307_vm0, %v588_v16  ;;  %v590_v20 = vsel %vm292_vm3, 1.0, %v712_v15 }
  0x93   : > { %v286_v17 = vpop.permute.xlu0 %285 }
  0x94   : > { %vm291_vm2 = vcmp.eq.s32.totalorder %v286_v17, %v280_v13  ;;  %v483_v13 = vld [vmem:[%s985_s5] sm:$0xff] }
  0x95   : > { %v589_v18 = vsel %vm291_vm2, 1.0, %v712_v15  ;;  %508 = vmatpush.msra.mxu3 %v483_v13 }
  0x96   : > { %592 = vmatmul.msk.f32.gmra.mxu0 %vm307_vm0, %v589_v18 }
  0x9e   : > { %593 = vmatmul.msk.f32.gmra.mxu0 %vm307_vm0, %v590_v20 }
 0x10b   : > { %v854_v27 = vpop.f32.mrf.mxu0 }
 0x10c   : > { %v379_v29 = vrot.slane %v854_v27, 4  ;;  %v356_v30 = vrot.slane %v854_v27, 2  ;;  %v346_v34 = vrot.slane %v854_v27, 1  ;;  %v367_v41 = vrot.slane %v854_v27, 3 }
 0x113   : > { %v856_v28 = vpop.f32.mrf.mxu0 }
 0x114   : > { %v347_v31 = vrot.slane %v856_v28, 1  ;;  %v380_v32 = vrot.slane %v856_v28, 4  ;;  %v357_v33 = vrot.slane %v856_v28, 2  ;;  %v368_v38 = vrot.slane %v856_v28, 3 }
 0x116   : > { %351 = vrot.lane.b32.xlu0 %v347_v31, %s713_s18  ;;  %v381_v35 = vsel %vm378_vm4, %v379_v29, %v380_v32  ;;  %v358_v36 = vsel %vm355_vm5, %v356_v30, %v357_v33  ;;  %v348_v37 = vsel %vm345_vm7, %v346_v34, %v347_v31  ;;  %v369_v42 = vsel %vm366_vm8, %v367_v41, %v368_v38 }
 0x117   : > { %594 = vmatmul.msk.f32.vlgmr.msra.gmra.mxu2 %vm384_vm6, %v381_v35  ;;  %359 = vrot.lane.b32.xlu2 %v358_v36, %s714_s19 }
 0x118   : > { %349 = vrot.lane.b32.xlu1 %v348_v37, %s713_s18  ;;  %s526_s18 = sshll.u32 %s270_s17, 4  ;;  %s527_s18 = int_to_ptr.vmem [resolvable:$true] %s526_s18 }
 0x11b   : > { %v340_v39 = vpop.f32.mrf.mxu0 }
 0x11c   : > { %v382_v40 = vrot.slane %v340_v39, 4  ;;  %v370_v44 = vrot.slane %v340_v39, 3 }
 0x11e   : > { %v383_v43 = vsel %vm378_vm4, %v380_v32, %v382_v40  ;;  %v371_v45 = vsel %vm366_vm8, %v368_v38, %v370_v44  ;;  %v489_v38 = vld [vmem:[%s986_s6] sm:$0x1] }
 0x11f   : > { %372 = vrot.lane.b32.xlu2 %v369_v42, %s715_s20  ;;  %595 = vmatmul.msk.f32.gmra.mxu2 %vm384_vm6, %v383_v43 }
 0x120   : > { %361 = vrot.lane.b32.xlu1 %v357_v33, %s714_s19  ;;  %s528_s19 = sshll.u32 %s524_s14, 4  ;;  %s529_s19 = int_to_ptr.hbm [resolvable:$true] %s528_s19 }
 0x121   : > { %s661_s21 = sshra.s32 %s529_s19, 4  ;;  %s662_s21 = int_to_ptr.hbm [resolvable:$true] %s661_s21 }
 0x122   : > { %s663_s22 = scalar_lea.hbm %s662_s21, 1  ;;  %p668_p0 = scmp.lt.s32.totalorder %s662_s21, %s987_s7 }
 0x123   : > { %p664_p11 = scmp.ne.s32.totalorder %s662_s21, %s663_s22  ;;  %p669_p1 = scmp.lt.s32.totalorder %s667_s29, %s663_s22 }
 0x125   : > { %p665_p12 = pnand %p664_p11, %p794_p5  ;;  %p670_p2 = por %p669_p1, %p668_p0 }
 0x127   : > { %374 = vrot.lane.b32.xlu2 %v371_v45, %s715_s20  ;;  %s516_s20 = scalar_lea.sflag [#allocation3], %s269_s8  ;;  %p666_p13 = pneg %p665_p12 }
 0x129   : > { %p671_p3 = pnand %p670_p2, %p666_p13 }
 0x171   : > { %v360_v60 = vpop.permute.xlu2 %359 }
 0x179   : > { %v373_v61 = vpop.permute.xlu2 %372 }
 0x181   : > { %v375_v5 = vpop.permute.xlu2 %374 }
 0x188   : > { %v352_v2 = vpop.permute.xlu0 %351 }
 0x189   : > { %v386_v3 = vsel %vm384_vm6, %v856_v28, %v352_v2 }
 0x18a   : > { %v350_v62 = vpop.permute.xlu1 %349 }
 0x18b   : > { %v385_v63 = vsel %vm384_vm6, %v854_v27, %v350_v62 }
 0x18c   : > { %v387_v0 = vsel %vm307_vm0, %v385_v63, %v360_v60 }
 0x18d   : > { %v390_v1 = vsel %vm389_vm9, %v387_v0, %v373_v61 }
 0x18e   : > { %436 = vmatmul.f32.vlgmr.msra.gmra.mxu1 %v390_v1 }
 0x192   : > { %v362_v4 = vpop.permute.xlu1 %361 }
 0x193   : > { %v388_v6 = vsel %vm307_vm0, %v386_v3, %v362_v4 }
 0x194   : > { %v391_v7 = vsel %vm389_vm9, %v388_v6, %v375_v5 }
 0x196   : > { %439 = vmatmul.f32.gmra.mxu1 %v391_v7 }
 0x19a   : > { %v460_v15 = vpop.f32.mrf.mxu2 }
 0x1a2   : > { %v463_v22 = vpop.f32.mrf.mxu2 }
 0x20b   : > { %v437_v16 = vpop.f32.mrf.mxu1 }
 0x20c   : > { %v438_v17 = vadd.f32 %v646_v14, %v437_v16 }
 0x20e   : > { %v461_v18 = vadd.f32 %v460_v15, %v438_v17 }
 0x210   : > { %v466_v20 = vmax.f32 %v461_v18, 0.0 }
 0x212   : > { %v470_v27 = vmul.f32 %v468_v23, %v466_v20 }
 0x213   : > { %v440_v19 = vpop.f32.mrf.mxu1 }
 0x214   : > { %v441_v21 = vadd.f32 %v646_v14, %v440_v19  ;;  %v473_v29 = vsel %vm472_vm10, %v470_v27, -inf }
 0x216   : > { %v464_v24 = vadd.f32 %v463_v22, %v441_v21 }
 0x218   : > { %v467_v26 = vmax.f32 %v464_v24, 0.0 }
 0x21a   : > { %v471_v28 = vmul.f32 %v469_v25, %v467_v26 }
 0x21c   : > { %v475_v30 = vsel %vm474_vm11, %v471_v28, -inf }
 0x21d   : > { %v476_v31 = vmax.f32 %v473_v29, %v475_v30 }
 0x21f   : > { %v477_v32 = vrot.slane %v476_v31, 4 }
 0x221   : > { %v478_v33 = vmax.f32 %v476_v31, %v477_v32 }
 0x223   : > { %v479_v34 = vrot.slane %v478_v33, 2 }
 0x225   : > { %v480_v35 = vmax.f32 %v478_v33, %v479_v34 }
 0x227   : > { %v481_v36 = vrot.slane %v480_v35, 1 }
 0x229   : > { %v482_v37 = vmax.f32 %v480_v35, %v481_v36 }
 0x22b   : > { %596 = vmatmul.msk.f32.vlgmr.msra.gmra.mxu3 %vm472_vm10, %v482_v37 }
 0x2ae   : > { %v510_v39 = vpop.f32.mrf.mxu3 }
 0x2af   : > { %v511_v40 = vadd.f32 %v510_v39, %v489_v38 }
 0x2b1   : > { %514 = vst.msk [vmem:[%s270_s17] sm:$0x1] %vm513_vm12, %v511_v40 }
 0x2b2   : > { %674 = shalt.err (!%p671_p3)
}
 0x2b3   : > { %600 = dma.vmem_to_hbm [thread:$0]  (%p794_p5), %s527_s18, 16, %s529_s19, %s516_s20  }
 0x2b4 PF: > { %p606_p4 = scmp.ge.s32.totalorder %s709_s27, 2  ;;  %s540_s8 = sand.u32 1, %s697_s24  }
 0x2b5   : > { %s541_s14 = scalar_lea.sflag [#allocation3], %s540_s8 }
 0x2b6   : > { %p603_p7 = pnand %p606_p4, %p798_p6 }
 0x2b8   : > { %p604_p8 = pneg %p603_p7 }
 0x2ba   : > { %692 = dma.done.wait (%p604_p8), %s541_s14, 16  }
 0x2bb   : > { %694 = vsyncadd (%p604_p8), %s541_s14, 4294967280  ;;  %p17_p9 = scmp.ge.s32.totalorder %s781_s30, 10   ;;  %s990_s24 = smov %s701_s25 }
 0x2bc   : > { %s991_s25 = smov %s705_s26  ;;  %s992_s26 = smov %s792_s10 }
 0x2bd   : > { %s993_s27 = smov %s781_s30  ;;  %19 = sbr.rel (!%p17_p9) target bundleno = 3 (0x3), region = 83 }
 0x2c2   :  { %546 = vsyncpa [#allocation3], 1 }
 0x2c3   :  { %548 = vsyncpa [#allocation3 + $0x1], 1 }

</bundles_post_ra>
